<compile_context>
chip_gen: v7x
topology: tpu7x:2x2x1
jax: 0.10.0
libtpu: 0.0.40
codegen_flags: <defaults>
</compile_context>

<pallas_src>
import functools

import jax
import jax.numpy as jnp
from jax.experimental import pallas as pl
from jax.experimental.pallas import tpu as pltpu

LANE = 128
SUBLANE = 8


def _dice_kernel(p_ref, t_ref, num_ref, den_ref, num_acc, den_acc, *, p_exp):
    j = pl.program_id(1)  # reduction (feature-chunk) axis

    @pl.when(j == 0)
    def _():
        num_acc[...] = jnp.zeros_like(num_acc)
        den_acc[...] = jnp.zeros_like(den_acc)

    pred = p_ref[0].astype(jnp.float32)  # (block_rows, 128)
    tgt = t_ref[0].astype(jnp.float32)

    if p_exp == 1:
        den_el = pred + tgt
    elif p_exp == 2:
        den_el = pred * pred + tgt * tgt
    else:
        den_el = jnp.power(pred, p_exp) + jnp.power(tgt, p_exp)
    num_el = pred * tgt

    # Fold tile-groups into an (8, 128) partial sum. The reshape keeps the
    # native (8, 128) vreg tiles intact, so the fold is pure VPU adds.
    block_rows = num_el.shape[0]
    groups = block_rows // SUBLANE
    num_acc[...] += jnp.sum(num_el.reshape(groups, SUBLANE, LANE), axis=0)
    den_acc[...] += jnp.sum(den_el.reshape(groups, SUBLANE, LANE), axis=0)

    @pl.when(j == pl.num_programs(1) - 1)
    def _():
        num_ref[0] = num_acc[...]
        den_ref[0] = den_acc[...]


def dice_loss(predict, target, smooth=1.0, p=2, reduction="mean",
              target_block_rows=512):
    """Pallas implementation of DiceLoss(smooth, p, reduction).forward."""
    assert predict.shape[0] == target.shape[0]
    B = predict.shape[0]
    pred2d = predict.reshape(B, -1)   # same as torch .contiguous().view(B, -1)
    tgt2d = target.reshape(B, -1)
    assert pred2d.shape == tgt2d.shape
    N = pred2d.shape[1]

    # Lane-dense tiling: rows of 128 lanes, sublane-aligned chunks.
    rows = -(-N // LANE)
    rows8 = -(-rows // SUBLANE) * SUBLANE
    n_chunks = max(1, -(-rows8 // target_block_rows))
    block_rows = -(-rows8 // n_chunks)
    block_rows = -(-block_rows // SUBLANE) * SUBLANE
    rows_padded = block_rows * n_chunks

    n_pad = rows_padded * LANE
    if n_pad != N:
        # Zero padding is exact: adds 0 to num (0*0) and 0 to den (0**p, p>0).
        pred2d = jnp.pad(pred2d, ((0, 0), (0, n_pad - N)))
        tgt2d = jnp.pad(tgt2d, ((0, 0), (0, n_pad - N)))

    pred3d = pred2d.reshape(B, rows_padded, LANE)
    tgt3d = tgt2d.reshape(B, rows_padded, LANE)

    kernel = functools.partial(_dice_kernel, p_exp=int(p))

    num_out, den_out = pl.pallas_call(
        kernel,
        out_shape=(
            jax.ShapeDtypeStruct((B, SUBLANE, LANE), jnp.float32),
            jax.ShapeDtypeStruct((B, SUBLANE, LANE), jnp.float32),
        ),
        grid_spec=pltpu.PrefetchScalarGridSpec(
            num_scalar_prefetch=0,
            grid=(B, n_chunks),
            in_specs=[
                pl.BlockSpec((1, block_rows, LANE), lambda b, j: (b, j, 0)),
                pl.BlockSpec((1, block_rows, LANE), lambda b, j: (b, j, 0)),
            ],
            out_specs=[
                pl.BlockSpec((1, SUBLANE, LANE), lambda b, j: (b, 0, 0)),
                pl.BlockSpec((1, SUBLANE, LANE), lambda b, j: (b, 0, 0)),
            ],
            scratch_shapes=[
                pltpu.VMEM((SUBLANE, LANE), jnp.float32),  # num accumulator
                pltpu.VMEM((SUBLANE, LANE), jnp.float32),  # den accumulator
            ],
        ),
        compiler_params=pltpu.CompilerParams(
            dimension_semantics=("parallel", "arbitrary"),
        ),
    )(pred3d, tgt3d)

    # Cheap finalize in the wrapper: cross-lane sums + smooth + divide + mean.
    num = jnp.sum(num_out.reshape(B, -1), axis=1) + smooth
    den = jnp.sum(den_out.reshape(B, -1), axis=1) + smooth
    loss = 1.0 - num / den
    if reduction == "mean":
        return jnp.mean(loss)
    elif reduction == "sum":
        return jnp.sum(loss)
    elif reduction == "none":
        return loss
    else:
        raise Exception("Unexpected reduction {}".format(reduction))


def dice_loss_ref(predict, target, smooth=1.0, p=2):
    """Pure-JAX reference matching the PyTorch module (reduction='mean')."""
    B = predict.shape[0]
    pred2d = predict.reshape(B, -1).astype(jnp.float32)
    tgt2d = target.reshape(B, -1).astype(jnp.float32)
    num = jnp.sum(pred2d * tgt2d, axis=1) + smooth
    den = jnp.sum(jnp.power(pred2d, p) + jnp.power(tgt2d, p), axis=1) + smooth
    loss = 1.0 - num / den
    return jnp.mean(loss)


if __name__ == "__main__":
    key = jax.random.PRNGKey(0)
    k1, k2, k3, k4 = jax.random.split(key, 4)

    # Case 1: NCHW inputs consistent with a segmentation head output.
    B, C, H, W = 2, 4, 16, 16
    predict = jax.nn.sigmoid(
        jax.random.normal(k1, (B, C, H, W), dtype=jnp.float32))
    target = (jax.random.uniform(k2, (B, C, H, W)) > 0.5).astype(jnp.float32)

    out = jax.block_until_ready(dice_loss(predict, target, smooth=1.0, p=2))
    ref = dice_loss_ref(predict, target, smooth=1.0, p=2)
    assert jnp.allclose(out, ref, rtol=1e-5, atol=1e-6), (out, ref)

    # Case 2: non-lane-aligned flattened size exercises the padding path.
    B2, C2, H2, W2 = 2, 3, 7, 9
    predict2 = jax.nn.sigmoid(
        jax.random.normal(k3, (B2, C2, H2, W2), dtype=jnp.float32))
    target2 = (jax.random.uniform(k4, (B2, C2, H2, W2)) > 0.5).astype(
        jnp.float32)

    out2 = jax.block_until_ready(dice_loss(predict2, target2, smooth=1.0, p=2))
    ref2 = dice_loss_ref(predict2, target2, smooth=1.0, p=2)
    assert jnp.allclose(out2, ref2, rtol=1e-5, atol=1e-6), (out2, ref2)

    print("KERNEL_OK")
</pallas_src>

<mosaic_0001>
module attributes {stable_mosaic.version = 11 : i64} {
  func.func @_dice_kernel(%arg0: i32, %arg1: i32, %arg2: memref<1x8x128xf32, #tpu.memory_space<vmem>>, %arg3: memref<1x8x128xf32, #tpu.memory_space<vmem>>, %arg4: memref<1x8x128xf32, #tpu.memory_space<vmem>>, %arg5: memref<1x8x128xf32, #tpu.memory_space<vmem>>, %arg6: memref<8x128xf32, #tpu.memory_space<vmem>>, %arg7: memref<8x128xf32, #tpu.memory_space<vmem>>) attributes {dimension_semantics = [#tpu.dimension_semantics<parallel>, #tpu.dimension_semantics<arbitrary>], iteration_bounds = array<i64: 2, 1>, scalar_prefetch = 0 : i64, scratch_operands = 2 : i64, tpu.core_type = #tpu.core_type<tc>, window_params = [{transform_indices = @transform_0, window_bounds = array<i64: 1, 8, 128>}, {transform_indices = @transform_1, window_bounds = array<i64: 1, 8, 128>}, {transform_indices = @transform_2, window_bounds = array<i64: 1, 8, 128>}, {transform_indices = @transform_3, window_bounds = array<i64: 1, 8, 128>}]} {
    %c0_i32 = arith.constant 0 : i32
    %0 = arith.cmpi eq, %arg1, %c0_i32 : i32
    %1 = arith.extui %0 : i1 to i32
    %c0_i32_0 = arith.constant 0 : i32
    %2 = arith.cmpi ne, %1, %c0_i32_0 : i32
    scf.if %2 {
      %cst_17 = arith.constant 0.000000e+00 : f32
      %24 = vector.broadcast %cst_17 : f32 to vector<8x128xf32>
      %c0_18 = arith.constant 0 : index
      %c0_19 = arith.constant 0 : index
      %25 = vector.load %arg6[%c0_18, %c0_19] : memref<8x128xf32, #tpu.memory_space<vmem>>, vector<8x128xf32>
      tpu.vector_store %arg6[%c0_18, %c0_19], %24 {strides = array<i32>} : memref<8x128xf32, #tpu.memory_space<vmem>>, vector<8x128xf32>,
      %cst_20 = arith.constant 0.000000e+00 : f32
      %26 = vector.broadcast %cst_20 : f32 to vector<8x128xf32>
      %c0_21 = arith.constant 0 : index
      %c0_22 = arith.constant 0 : index
      %27 = vector.load %arg7[%c0_21, %c0_22] : memref<8x128xf32, #tpu.memory_space<vmem>>, vector<8x128xf32>
      tpu.vector_store %arg7[%c0_21, %c0_22], %26 {strides = array<i32>} : memref<8x128xf32, #tpu.memory_space<vmem>>, vector<8x128xf32>,
    } else {
    }
    %c0 = arith.constant 0 : index
    %c0_1 = arith.constant 0 : index
    %c0_2 = arith.constant 0 : index
    %3 = vector.load %arg2[%c0, %c0_1, %c0_2] : memref<1x8x128xf32, #tpu.memory_space<vmem>>, vector<1x8x128xf32>
    %4 = vector.shape_cast %3 : vector<1x8x128xf32> to vector<8x128xf32>
    %c0_3 = arith.constant 0 : index
    %c0_4 = arith.constant 0 : index
    %c0_5 = arith.constant 0 : index
    %5 = vector.load %arg3[%c0_3, %c0_4, %c0_5] : memref<1x8x128xf32, #tpu.memory_space<vmem>>, vector<1x8x128xf32>
    %6 = vector.shape_cast %5 : vector<1x8x128xf32> to vector<8x128xf32>
    %7 = arith.mulf %4, %4 : vector<8x128xf32>
    %8 = arith.mulf %6, %6 : vector<8x128xf32>
    %9 = arith.addf %7, %8 : vector<8x128xf32>
    %10 = arith.mulf %4, %6 : vector<8x128xf32>
    %c0_6 = arith.constant 0 : index
    %c0_7 = arith.constant 0 : index
    %11 = vector.load %arg6[%c0_6, %c0_7] : memref<8x128xf32, #tpu.memory_space<vmem>>, vector<8x128xf32>
    %12 = vector.shape_cast %10 : vector<8x128xf32> to vector<1x8x128xf32>
    %cst = arith.constant dense<0.000000e+00> : vector<8x128xf32>
    %13 = vector.multi_reduction <add>, %12, %cst [0] : vector<1x8x128xf32> to vector<8x128xf32>
    %14 = arith.addf %11, %13 : vector<8x128xf32>
    %c0_8 = arith.constant 0 : index
    %c0_9 = arith.constant 0 : index
    %15 = vector.load %arg6[%c0_8, %c0_9] : memref<8x128xf32, #tpu.memory_space<vmem>>, vector<8x128xf32>
    tpu.vector_store %arg6[%c0_8, %c0_9], %14 {strides = array<i32>} : memref<8x128xf32, #tpu.memory_space<vmem>>, vector<8x128xf32>,
    %c0_10 = arith.constant 0 : index
    %c0_11 = arith.constant 0 : index
    %16 = vector.load %arg7[%c0_10, %c0_11] : memref<8x128xf32, #tpu.memory_space<vmem>>, vector<8x128xf32>
    %17 = vector.shape_cast %9 : vector<8x128xf32> to vector<1x8x128xf32>
    %cst_12 = arith.constant dense<0.000000e+00> : vector<8x128xf32>
    %18 = vector.multi_reduction <add>, %17, %cst_12 [0] : vector<1x8x128xf32> to vector<8x128xf32>
    %19 = arith.addf %16, %18 : vector<8x128xf32>
    %c0_13 = arith.constant 0 : index
    %c0_14 = arith.constant 0 : index
    %20 = vector.load %arg7[%c0_13, %c0_14] : memref<8x128xf32, #tpu.memory_space<vmem>>, vector<8x128xf32>
    tpu.vector_store %arg7[%c0_13, %c0_14], %19 {strides = array<i32>} : memref<8x128xf32, #tpu.memory_space<vmem>>, vector<8x128xf32>,
    %c0_i32_15 = arith.constant 0 : i32
    %21 = arith.cmpi eq, %arg1, %c0_i32_15 : i32
    %22 = arith.extui %21 : i1 to i32
    %c0_i32_16 = arith.constant 0 : i32
    %23 = arith.cmpi ne, %22, %c0_i32_16 : i32
    scf.if %23 {
      %c0_17 = arith.constant 0 : index
      %c0_18 = arith.constant 0 : index
      %24 = vector.load %arg6[%c0_17, %c0_18] : memref<8x128xf32, #tpu.memory_space<vmem>>, vector<8x128xf32>
      %c0_19 = arith.constant 0 : index
      %c0_20 = arith.constant 0 : index
      %c0_21 = arith.constant 0 : index
      %25 = vector.load %arg4[%c0_19, %c0_20, %c0_21] : memref<1x8x128xf32, #tpu.memory_space<vmem>>, vector<1x8x128xf32>
      %26 = vector.shape_cast %25 : vector<1x8x128xf32> to vector<8x128xf32>
      %27 = vector.shape_cast %24 : vector<8x128xf32> to vector<1x8x128xf32>
      tpu.vector_store %arg4[%c0_19, %c0_20, %c0_21], %27 {strides = array<i32>} : memref<1x8x128xf32, #tpu.memory_space<vmem>>, vector<1x8x128xf32>,
      %c0_22 = arith.constant 0 : index
      %c0_23 = arith.constant 0 : index
      %28 = vector.load %arg7[%c0_22, %c0_23] : memref<8x128xf32, #tpu.memory_space<vmem>>, vector<8x128xf32>
      %c0_24 = arith.constant 0 : index
      %c0_25 = arith.constant 0 : index
      %c0_26 = arith.constant 0 : index
      %29 = vector.load %arg5[%c0_24, %c0_25, %c0_26] : memref<1x8x128xf32, #tpu.memory_space<vmem>>, vector<1x8x128xf32>
      %30 = vector.shape_cast %29 : vector<1x8x128xf32> to vector<8x128xf32>
      %31 = vector.shape_cast %28 : vector<8x128xf32> to vector<1x8x128xf32>
      tpu.vector_store %arg5[%c0_24, %c0_25, %c0_26], %31 {strides = array<i32>} : memref<1x8x128xf32, #tpu.memory_space<vmem>>, vector<1x8x128xf32>,
    } else {
    }
    return
  }
  func.func @transform_0(%arg0: i32, %arg1: i32) -> (i32, i32, i32) {
    %c0_i32 = arith.constant 0 : i32
    %c0_i32_0 = arith.constant 0 : i32
    return %arg0, %arg1, %c0_i32 : i32, i32, i32
  }
  func.func @transform_1(%arg0: i32, %arg1: i32) -> (i32, i32, i32) {
    %c0_i32 = arith.constant 0 : i32
    %c0_i32_0 = arith.constant 0 : i32
    return %arg0, %arg1, %c0_i32 : i32, i32, i32
  }
  func.func @transform_2(%arg0: i32, %arg1: i32) -> (i32, i32, i32) {
    %c0_i32 = arith.constant 0 : i32
    %c0_i32_0 = arith.constant 0 : i32
    %c0_i32_1 = arith.constant 0 : i32
    return %arg0, %c0_i32, %c0_i32_0 : i32, i32, i32
  }
  func.func @transform_3(%arg0: i32, %arg1: i32) -> (i32, i32, i32) {
    %c0_i32 = arith.constant 0 : i32
    %c0_i32_0 = arith.constant 0 : i32
    %c0_i32_1 = arith.constant 0 : i32
    return %arg0, %c0_i32, %c0_i32_0 : i32, i32, i32
  }
}

</mosaic_0001>

<bundles_post_ra>
// kernel: tpu_custom_call.1
= control target key start
LH: loop header
LB: loop body
LE: loop exit
PB: predicated region body
PF: predicated region fallthrough
CT: control target
= control target key end

     0   :  { %9 = vsyncpa [#allocation5], 0  ;;  %s1000_s0 = inlined_call_operand.hbm [shape: f32[2,8,128], index: 0, kind: input, shape index: {}]   ;;  %s1001_s1 = inlined_call_operand.hbm [shape: f32[2,8,128], index: 1, kind: input, shape index: {}]   ;;  %s1002_s2 = inlined_call_operand.hbm [shape: f32[2,8,128], index: 2, kind: output, shape index: {0}]   ;;  %s1003_s3 = inlined_call_operand.hbm [shape: f32[2,8,128], index: 3, kind: output, shape index: {1}]  }
   0x1   :  { %11 = vsyncpa [#allocation5 + $0x1], 0 }
   0x2   :  { %12 = vsyncpa [#allocation8], 0 }
   0x3   :  { %14 = vsyncpa [#allocation8 + $0x1], 0 }
   0x4   :  { %15 = vsyncpa [#allocation6], 0 }
   0x5   :  { %17 = vsyncpa [#allocation6 + $0x1], 0 }
   0x6   :  { %18 = vsyncpa [#allocation11], 0 }
   0x7   :  { %20 = vsyncpa [#allocation11 + $0x1], 0  ;;  %s741_s12 = smov 0   ;;  %s743_s13 = smov 0  }
   0x8   :  { %s745_s14 = smov 0   ;;  %s747_s15 = smov 0  }
   0x9   :  { %s749_s16 = smov 0   ;;  %s751_s17 = smov 0  }
   0xa LB: > { %s446_s18 = sadd.s32 4294967295, %s715_s17   ;;  %s447_s19 = sadd.s32 4294967294, %s715_s17   ;;  %s715_s17 = sphi %s751_s17, %s26_s17   ;;  %s711_s16 = sphi %s749_s16, %s1023_s16   ;;  %s707_s15 = sphi %s747_s15, %s1022_s15   ;;  %s703_s14 = sphi %s745_s14, %s1021_s14   ;;  %s699_s13 = sphi %s743_s13, %s1020_s13   ;;  %s695_s12 = sphi %s741_s12, %s1019_s12  }
   0xb   : > { %s38_s20 = sadd.s32 1, %s711_s16  ;;  %s47_s21 = sadd.s32 1, %s703_s14 }
   0xc   : > { %p40_p0 = scmp.ge.s32.totalorder %s38_s20, 2  ;;  %p54_p1 = scmp.ne.s32.totalorder %s703_s14, %s699_s13 }
   0xd   : > { %p55_p2 = scmp.eq.s32.totalorder %s715_s17, 0  ;;  %p60_p3 = scmp.ne.s32.totalorder %s699_s13, %s695_s12 }
   0xe   : > { %s1025_s20 = smov (%p40_p0, %s38_s20), 0  ;;  %p61_p5 = scmp.eq.s32.totalorder %s446_s18, 0 }
   0xf   : > { %p782_p4 = por %p55_p2, %p54_p1  ;;  %s42_s23 = ssub.s32 %s711_s16, %s1025_s20 }
  0x10   : > { %p112_p6 = scmp.eq.s32.totalorder %s446_s18, 1  ;;  %p45_p7 = scmp.eq.s32.totalorder %s42_s23, 0 }
  0x11   : > { %p788_p8 = por %p61_p5, %p60_p3  ;;  %p118_p10 = scmp.eq.s32.totalorder %s447_s19, 1 }
  0x12   : > { %p792_p9 = por %p112_p6, %p54_p1  ;;  %p487_p13 = scmp.lt.s32.totalorder %s715_s17, 2 }
  0x13   : > { %s1007_s24 = scalar_select %p788_p8, 1, 0 }
  0x14   : > { %s1008_s25 = scalar_select %p792_p9, 1, 0 }
  0x15   : > { %s797_s26 = scalar_select %p45_p7, %s703_s14, %s47_s21  }
  0x16   : > { %p799_p11 = por %p118_p10, %p60_p3  ;;  %s806_s28 = sand.u32 1, %s703_s14  }
  0x17   : > { %s450_s29 = sshll.u32 %s806_s28, 3  ;;  %s451_s30 = sshll.u32 %s711_s16, 7 }
  0x18   : > { %s1009_s27 = scalar_select %p799_p11, 1, 0 }
  0x19   : > { %s815_s6 = scalar_lea.hbm %s1000_s0, %s451_s30  ;;  %s168_s7 = scalar_lea.vmem [#allocation4], %s450_s29 }
  0x1a   : > { %s176_s8 = sshll.u32 %s168_s7, 4  ;;  %p823_p0 = pnand %p487_p13, %p782_p4  ;;  %s819_s8 = int_to_ptr.vmem [resolvable:$true] %s176_s8 }
  0x1b   : > { %s165_s10 = scalar_lea.sflag [#allocation5], %s806_s28  ;;  %s537_s11 = scalar_lea.hbm %s815_s6, 128 }
  0x1c   : > { %p538_p3 = scmp.ne.s32.totalorder %s815_s6, %s537_s11  ;;  %p539_p5 = pneg %p823_p0 }
  0x1d   : > { %s542_s21 = scalar_lea.hbm %s1000_s0, 256  ;;  %p543_p4 = scmp.lt.u32.totalorder %s815_s6, %s1000_s0 }
  0x1e   : > { %p540_p6 = pnand %p539_p5, %p538_p3  ;;  %p544_p10 = scmp.lt.u32.totalorder %s542_s21, %s537_s11 }
  0x1f   : > { %p546_p12 = scmp.lt.u32.totalorder %s537_s11, %s815_s6 }
  0x20   : > { %p541_p7 = pneg %p540_p6  ;;  %p545_p13 = por %p544_p10, %p543_p4 }
  0x22   : > { %p547_p1 = por %p546_p12, %p545_p13 }
  0x24   : > { %p548_p2 = pnand %p547_p1, %p541_p7 }
  0x26   : > { %551 = shalt.err (!%p548_p2)
}
  0x27   : > { %s552_s4 = scalar_lea.vmem %s819_s8, 128  ;;  %s717_s5 = smov [#allocation4]  }
  0x28   : > { %p553_p3 = scmp.ne.s32.totalorder %s819_s8, %s552_s4  ;;  %s557_s7 = sshll.u32 %s717_s5, 4  ;;  %s558_s7 = int_to_ptr.vmem [resolvable:$false] %s557_s7 }
  0x29   : > { %s559_s18 = scalar_lea.vmem %s558_s7, 256  ;;  %p560_p9 = scmp.lt.s32.totalorder %s819_s8, %s558_s7 }
  0x2a   : > { %p555_p6 = pnand %p553_p3, %p539_p5  ;;  %p561_p4 = scmp.lt.s32.totalorder %s559_s18, %s552_s4 }
  0x2c   : > { %p556_p11 = pneg %p555_p6  ;;  %p562_p10 = por %p561_p4, %p560_p9 }
  0x2e   : > { %p563_p12 = pnand %p562_p10, %p556_p11 }
  0x30   : > { %566 = shalt.err (!%p563_p12)
}
  0x31   : > { %476 = dma.hbm_to_vmem [thread:$0]  (!%p823_p0), %s815_s6, 128, %s819_s8, %s165_s10  }
  0x32   : > { %p1011_p1 = scmp.lt.s32.totalorder %s715_s17, 3  ;;  %p1012_p2 = scmp.ge.s32.totalorder %s715_s17, 1 }
  0x33   : > { %s868_s22 = scalar_lea.hbm %s1001_s1, %s451_s30  ;;  %s187_s23 = scalar_lea.vmem [#allocation7], %s450_s29 }
  0x34   : > { %p859_p7 = pnand %p1012_p2, %p1011_p1  ;;  %s195_s4 = sshll.u32 %s187_s23, 4  ;;  %s196_s4 = int_to_ptr.vmem [resolvable:$true] %s195_s4 }
  0x35   : > { %s184_s6 = scalar_lea.sflag [#allocation8], %s806_s28  ;;  %s567_s8 = scalar_lea.hbm %s868_s22, 128 }
  0x36   : > { %s1013_s11 = scalar_select %p859_p7, 1, 0 }
  0x37   : > { %p568_p9 = scmp.ne.s32.totalorder %s868_s22, %s567_s8  ;;  %s572_s30 = scalar_lea.hbm %s1001_s1, 256 }
  0x38   : > { %p573_p3 = scmp.lt.u32.totalorder %s868_s22, %s1001_s1  ;;  %p574_p6 = scmp.lt.u32.totalorder %s572_s30, %s567_s8 }
  0x39   : > { %p570_p11 = pnand %p568_p9, %p539_p5  ;;  %p576_p10 = scmp.lt.u32.totalorder %s567_s8, %s868_s22 }
  0x3a   : > { %p575_p4 = por %p574_p6, %p573_p3 }
  0x3b   : > { %p571_p13 = pneg %p570_p11 }
  0x3c   : > { %p577_p12 = por %p576_p10, %p575_p4 }
  0x3e   : > { %p578_p1 = pnand %p577_p12, %p571_p13 }
  0x40   : > { %581 = shalt.err (!%p578_p1)
}
  0x41   : > { %s582_s28 = scalar_lea.vmem %s196_s4, 128  ;;  %s718_s29 = smov [#allocation7]  }
  0x42   : > { %p583_p2 = scmp.ne.s32.totalorder %s196_s4, %s582_s28  ;;  %s587_s19 = sshll.u32 %s718_s29, 4  ;;  %s588_s19 = int_to_ptr.vmem [resolvable:$false] %s587_s19 }
  0x43   : > { %s589_s21 = scalar_lea.vmem %s588_s19, 256  ;;  %p590_p8 = scmp.lt.s32.totalorder %s196_s4, %s588_s19 }
  0x44   : > { %p585_p9 = pnand %p583_p2, %p539_p5  ;;  %p591_p7 = scmp.lt.s32.totalorder %s589_s21, %s582_s28 }
  0x46   : > { %p586_p11 = pneg %p585_p9  ;;  %p592_p3 = por %p591_p7, %p590_p8 }
  0x48   : > { %p593_p6 = pnand %p592_p3, %p586_p11 }
  0x4a   : > { %596 = shalt.err (!%p593_p6)
}
  0x4b   : > { %479 = dma.hbm_to_vmem [thread:$0]  (!%p823_p0), %s868_s22, 128, %s196_s4, %s184_s6  }
  0x4c   : > { %p1014_p13 = scmp.ne.s32.totalorder %s1013_s11, 0 }
  0x4d   : > { %s895_s23 = sand.u32 (!%p1014_p13), 1, %s699_s13   ;;  %p1015_p8 = scmp.ne.s32.totalorder (!%p1014_p13), %s1007_s24, 0 }
  0x4e   : > { %204 = sbr.rel (%p1014_p13) target bundleno = 138 (0x8a), region = 28  ;;  %s898_s8 = sshll.u32 (!%p1014_p13), %s895_s23, 3 }
  0x4f   : > { %s207_s10 = scalar_lea.sflag (!%p1014_p13), [#allocation5], %s895_s23  ;;  %s210_s5 = scalar_lea.vmem (!%p1014_p13), [#allocation4], %s898_s8 }
  0x55   : > { %678 = dma.done.wait (%p1015_p8), %s207_s10, 128  }
  0x56   : > { %680 = vsyncadd (%p1015_p8), %s207_s10, 4294967168  ;;  %s216_s9 = scalar_lea.sflag [#allocation8], %s895_s23  ;;  %s219_s11 = scalar_lea.vmem [#allocation7], %s898_s8 }
  0x57   : > { %682 = dma.done.wait (%p1015_p8), %s216_s9, 128  }
  0x58   : > { %684 = vsyncadd (%p1015_p8), %s216_s9, 4294967168  ;;  %s244_s22 = scalar_lea.vmem [#allocation9], %s898_s8  ;;  %s461_s6 = sshll.u32 %s707_s15, 7  ;;  %v258_v0 = vld [vmem:[%s210_s5] sm:$0xff]  ;;  %v259_v1 = vld [vmem:[%s219_s11] sm:$0xff] }
  0x59   : > { %s298_s4 = sshll.u32 %s244_s22, 4  ;;  %s251_s30 = scalar_lea.vmem [#allocation10], %s898_s8  ;;  %v263_v2 = vmul.f32 %v259_v1, %v258_v0  ;;  %v260_v3 = vmul.f32 %v258_v0, %v258_v0  ;;  %v261_v4 = vmul.f32 %v259_v1, %v259_v1  ;;  %s917_s4 = int_to_ptr.vmem [resolvable:$true] %s298_s4 }
  0x5a   : > { %s311_s7 = sshll.u32 %s251_s30, 4  ;;  %s922_s28 = scalar_lea.hbm %s1002_s2, %s461_s6  ;;  %s924_s7 = int_to_ptr.vmem [resolvable:$true] %s311_s7 }
  0x5b   : > { %276 = vst [vmem:[%s244_s22] sm:$0xff] %v263_v2  ;;  %v262_v5 = vadd.f32 %v261_v4, %v260_v3  ;;  %s929_s19 = scalar_lea.hbm %s1003_s3, %s461_s6  ;;  %s280_s21 = scalar_lea.sflag [#allocation6], %s895_s23 }
  0x5c   : > { %s597_s10 = scalar_lea.vmem %s917_s4, 128  ;;  %p1016_p5 = scmp.ne.s32.totalorder %s1008_s25, 0 }
  0x5d   : > { %p598_p0 = scmp.ne.s32.totalorder %s917_s4, %s597_s10  ;;  %s719_s5 = smov [#allocation9]  }
  0x5e   : > { %s601_s9 = sshll.u32 %s719_s5, 4  ;;  %s602_s9 = int_to_ptr.vmem [resolvable:$false] %s601_s9 }
  0x5f   : > { %p599_p7 = pnand %p598_p0, %p1016_p5  ;;  %s603_s11 = scalar_lea.vmem %s602_s9, 256 }
  0x60   : > { %p604_p10 = scmp.lt.s32.totalorder %s917_s4, %s602_s9  ;;  %p605_p12 = scmp.lt.s32.totalorder %s603_s11, %s597_s10 }
  0x61   : > { %p600_p4 = pneg %p599_p7 }
  0x62   : > { %p606_p1 = por %p605_p12, %p604_p10 }
  0x64   : > { %p607_p2 = pnand %p606_p1, %p600_p4 }
  0x66   : > { %610 = shalt.err (!%p607_p2)
}
  0x67   : > { %s611_s22 = scalar_lea.hbm %s922_s28, 128  ;;  %s615_s18 = scalar_lea.hbm %s1002_s2, 256 }
  0x68   : > { %p612_p9 = scmp.ne.s32.totalorder %s922_s28, %s611_s22  ;;  %p616_p6 = scmp.lt.u32.totalorder %s922_s28, %s1002_s2 }
  0x69   : > { %p617_p13 = scmp.lt.u32.totalorder %s615_s18, %s611_s22  ;;  %p619_p0 = scmp.lt.u32.totalorder %s611_s22, %s922_s28 }
  0x6a   : > { %p613_p11 = pnand %p612_p9, %p1016_p5 }
  0x6b   : > { %p618_p8 = por %p617_p13, %p616_p6 }
  0x6c   : > { %p614_p3 = pneg %p613_p11 }
  0x6d   : > { %p620_p7 = por %p619_p0, %p618_p8 }
  0x6f   : > { %p621_p4 = pnand %p620_p7, %p614_p3 }
  0x71   : > { %624 = shalt.err (!%p621_p4)
}
  0x72   : > { %469 = dma.vmem_to_hbm [thread:$0]  (%p1016_p5), %s917_s4, 128, %s922_s28, %s280_s21   ;;  %278 = vst [vmem:[%s251_s30] sm:$0xff] %v262_v5 }
  0x73   : > { %s285_s10 = scalar_lea.sflag [#allocation11], %s895_s23  ;;  %s625_s5 = scalar_lea.vmem %s924_s7, 128 }
  0x74   : > { %p626_p10 = scmp.ne.s32.totalorder %s924_s7, %s625_s5  ;;  %s720_s9 = smov [#allocation10]  }
  0x75   : > { %s629_s11 = sshll.u32 %s720_s9, 4  ;;  %s630_s11 = int_to_ptr.vmem [resolvable:$false] %s629_s11 }
  0x76   : > { %p627_p12 = pnand %p626_p10, %p1016_p5  ;;  %s631_s22 = scalar_lea.vmem %s630_s11, 256 }
  0x77   : > { %p632_p2 = scmp.lt.s32.totalorder %s924_s7, %s630_s11  ;;  %p633_p9 = scmp.lt.s32.totalorder %s631_s22, %s625_s5 }
  0x78   : > { %p628_p1 = pneg %p627_p12 }
  0x79   : > { %p634_p11 = por %p633_p9, %p632_p2 }
  0x7b   : > { %p635_p3 = pnand %p634_p11, %p628_p1 }
  0x7d   : > { %638 = shalt.err (!%p635_p3)
}
  0x7e   : > { %s639_s23 = scalar_lea.hbm %s929_s19, 128  ;;  %s643_s30 = scalar_lea.hbm %s1003_s3, 256 }
  0x7f   : > { %p640_p6 = scmp.ne.s32.totalorder %s929_s19, %s639_s23  ;;  %p644_p0 = scmp.lt.u32.totalorder %s929_s19, %s1003_s3 }
  0x80   : > { %p645_p7 = scmp.lt.u32.totalorder %s643_s30, %s639_s23  ;;  %p647_p10 = scmp.lt.u32.totalorder %s639_s23, %s929_s19 }
  0x81   : > { %p641_p13 = pnand %p640_p6, %p1016_p5 }
  0x82   : > { %p646_p4 = por %p645_p7, %p644_p0 }
  0x83   : > { %p642_p8 = pneg %p641_p13 }
  0x84   : > { %p648_p12 = por %p647_p10, %p646_p4 }
  0x86   : > { %p649_p1 = pnand %p648_p12, %p642_p8 }
  0x88   : > { %652 = shalt.err (!%p649_p1)
}
  0x89   : > { %470 = dma.vmem_to_hbm [thread:$0]  (%p1016_p5), %s924_s7, 128, %s929_s19, %s285_s10  }
  0x8a PF: > { %s323_s6 = sand.u32 1, %s695_s12   ;;  %p1017_p2 = scmp.ne.s32.totalorder %s1009_s27, 0 }
  0x8b   : > { %p1018_p9 = scmp.ge.s32.totalorder %s715_s17, 2  ;;  %s324_s24 = scalar_lea.sflag [#allocation6], %s323_s6 }
  0x8d   : > { %p481_p11 = pnand %p1018_p9, %p1017_p2 }
  0x8f   : > { %686 = dma.done.wait (!%p481_p11), %s324_s24, 128  }
  0x90   : > { %688 = vsyncadd (!%p481_p11), %s324_s24, 4294967168  ;;  %s333_s18 = scalar_lea.sflag [#allocation11], %s323_s6 }
  0x91   : > { %690 = dma.done.wait (!%p481_p11), %s333_s18, 128  }
  0x92   : > { %692 = vsyncadd (!%p481_p11), %s333_s18, 4294967168  ;;  %s26_s17 = sadd.s32 1, %s715_s17   ;;  %s1019_s12 = smov %s699_s13 }
  0x93   : > { %p23_p3 = scmp.ge.s32.totalorder %s26_s17, 4   ;;  %s1020_s13 = smov %s703_s14 }
  0x94   : > { %s1021_s14 = smov %s797_s26  ;;  %s1022_s15 = smov %s711_s16 }
  0x95   : > { %s1023_s16 = smov %s1025_s20  ;;  %25 = sbr.rel (!%p23_p3) target bundleno = 10 (0xa), region = 111 }
  0x9c   :  { %338 = vsyncpa [#allocation5], 1 }
  0x9d   :  { %340 = vsyncpa [#allocation5 + $0x1], 1 }
  0x9e   :  { %341 = vsyncpa [#allocation8], 1 }
  0x9f   :  { %343 = vsyncpa [#allocation8 + $0x1], 1 }
  0xa0   :  { %344 = vsyncpa [#allocation6], 1 }
  0xa1   :  { %346 = vsyncpa [#allocation6 + $0x1], 1 }
  0xa2   :  { %347 = vsyncpa [#allocation11], 1 }
  0xa3   :  { %349 = vsyncpa [#allocation11 + $0x1], 1 }

</bundles_post_ra>
